<compile_context>
chip_gen: v5e
topology: v5e:2x2
jax: 0.10.0
libtpu: 0.0.40
codegen_flags: <defaults>
</compile_context>

<pallas_src>
import functools

import jax
import jax.numpy as jnp
from jax import lax
from jax.experimental import pallas as pl
from jax.experimental.pallas import tpu as pltpu


def make_pe_table(d_model: int, max_len: int = 500) -> jnp.ndarray:
    """Sinusoidal positional-encoding buffer pe[max_len, 1, d_model] (f32)."""
    position = jnp.arange(max_len, dtype=jnp.float32)[:, None]            # (L, 1)
    div_term = jnp.exp(
        jnp.arange(0, d_model, 2, dtype=jnp.float32)
        * (-jnp.log(10000.0) / d_model)
    )                                                                      # (D/2,)
    pe = jnp.zeros((max_len, d_model), dtype=jnp.float32)
    pe = pe.at[:, 0::2].set(jnp.sin(position * div_term))
    pe = pe.at[:, 1::2].set(jnp.cos(position * div_term))
    return pe[:, None, :]                                                  # (L, 1, D)


def _pe_dropout_kernel(seed_ref, x_ref, pe_ref, o_ref, *,
                       p, training, block_rows, row_width):
    # x_ref / pe_ref / o_ref : (block_rows, row_width) lane-dense 2-D tiles.
    y = x_ref[...] + pe_ref[...]

    if training and p > 0.0:
        # Inverted dropout via a stateless counter hash (seed + global element
        # index).  Identical mask regardless of tiling / megacore sharding,
        # lowers on TPU and in interpret mode (integer VPU ops only).
        i = pl.program_id(0)
        row0 = (i * block_rows).astype(jnp.uint32)
        rows = lax.broadcasted_iota(jnp.uint32, y.shape, 0) + row0
        cols = lax.broadcasted_iota(jnp.uint32, y.shape, 1)
        seed = seed_ref[0].astype(jnp.uint32)
        h = rows * jnp.uint32(row_width) + cols + seed * jnp.uint32(0x9E3779B9)
        # murmur-style 32-bit finalizer.
        h = h ^ (h >> 16)
        h = h * jnp.uint32(0x7FEB352D)
        h = h ^ (h >> 15)
        h = h * jnp.uint32(0x846CA68B)
        h = h ^ (h >> 16)
        # Integer-threshold keep test on the top 24 bits (no float convert).
        r24 = (h >> 8).astype(jnp.int32)                 # uniform in [0, 2^24)
        threshold = int(round(float(p) * float(1 << 24)))
        keep = r24 >= jnp.int32(threshold)               # P(keep) = 1 - p
        scale = jnp.asarray(1.0 / (1.0 - p), dtype=y.dtype)
        y = jnp.where(keep, y * scale, jnp.zeros_like(y))

    o_ref[...] = y


def positional_encoding(x, pe_table, *, p=0.1, training=False, seed=0):
    """x: (seq_len, batch, d_model) -> same shape, x + pe[:seq_len] then dropout."""
    S, B, D = x.shape
    W = B * D
    itemsize = jnp.dtype(x.dtype).itemsize

    # Lane-dense layout: fold batch into the lane (last) axis -> (S, B*D).
    x2d = x.reshape(S, W)
    pe2d = (
        jnp.broadcast_to(pe_table[:S], (S, B, D))
        .reshape(S, W)
        .astype(x.dtype)
    )

    # Row-tile size: multiple of 8, ~2 MiB of x per block so the auto
    # double-buffered pipeline overlaps HBM DMA with compute while
    # 2 bufs x (x + pe + out) stays well under the v7x 64 MiB VMEM.
    target_block_bytes = 2 << 20
    ts = target_block_bytes // max(W * itemsize, 1)
    ts = max(8, (ts // 8) * 8)
    if ts >= S:
        ts = S                      # full-extent block is always legal
    grid = (pl.cdiv(S, ts),)

    block_bytes = ts * W * itemsize
    vmem_limit = int(min(max(2 * 3 * block_bytes + (4 << 20), 16 << 20), 32 << 20))

    seed_arr = jnp.asarray([seed], dtype=jnp.int32)
    kernel = functools.partial(
        _pe_dropout_kernel,
        p=float(p), training=bool(training),
        block_rows=int(ts), row_width=int(W),
    )

    grid_spec = pltpu.PrefetchScalarGridSpec(
        num_scalar_prefetch=1,
        grid=grid,
        in_specs=[
            pl.BlockSpec((ts, W), lambda i, seed_ref: (i, 0)),   # x tile
            pl.BlockSpec((ts, W), lambda i, seed_ref: (i, 0)),   # pe tile
        ],
        out_specs=pl.BlockSpec((ts, W), lambda i, seed_ref: (i, 0)),
    )

    out2d = pl.pallas_call(
        kernel,
        out_shape=jax.ShapeDtypeStruct((S, W), x.dtype),
        grid_spec=grid_spec,
        compiler_params=pltpu.CompilerParams(
            dimension_semantics=("parallel",),   # v7x: shard row tiles over both TCs
            vmem_limit_bytes=vmem_limit,
        ),
        cost_estimate=pl.CostEstimate(
            flops=2 * S * W,
            transcendentals=0,
            bytes_accessed=3 * S * W * itemsize,
        ),
    )(seed_arr, x2d, pe2d)

    return out2d.reshape(S, B, D)


if __name__ == "__main__":
    d_model = 32
    seq_len = 8
    batch = 2

    key = jax.random.PRNGKey(0)
    x = jax.random.normal(key, (seq_len, batch, d_model), dtype=jnp.float32)

    pe_table = make_pe_table(d_model, max_len=500)

    # Eval-mode forward (dropout = identity): must match reference exactly.
    out_eval = positional_encoding(x, pe_table, p=0.1, training=False)
    out_eval = jax.block_until_ready(out_eval)
    ref = x + pe_table[:seq_len]
    assert out_eval.shape == (seq_len, batch, d_model)
    assert jnp.allclose(out_eval, ref, atol=1e-6, rtol=1e-6), "eval-mode mismatch"

    # Training-mode forward (exercise in-kernel dropout path).
    out_train = positional_encoding(x, pe_table, p=0.1, training=True, seed=123)
    out_train = jax.block_until_ready(out_train)
    assert out_train.shape == (seq_len, batch, d_model)
    # Surviving elements are exactly ref / (1 - p); dropped ones are 0.
    scaled = ref / (1.0 - 0.1)
    ok = jnp.logical_or(jnp.isclose(out_train, scaled, atol=1e-5),
                        out_train == 0.0)
    assert bool(jnp.all(ok)), "training-mode dropout values inconsistent"

    print("KERNEL_OK")
</pallas_src>

<mosaic_0001>
module attributes {stable_mosaic.version = 11 : i64} {
  func.func @_pe_dropout_kernel(%arg0: i32, %arg1: memref<1xi32, #tpu.memory_space<smem>>, %arg2: memref<8x64xf32, #tpu.memory_space<vmem>>, %arg3: memref<8x64xf32, #tpu.memory_space<vmem>>, %arg4: memref<8x64xf32, #tpu.memory_space<vmem>>) attributes {dimension_semantics = [#tpu.dimension_semantics<parallel>], iteration_bounds = array<i64: 1>, scalar_prefetch = 1 : i64, scratch_operands = 0 : i64, tpu.core_type = #tpu.core_type<tc>, window_params = [{transform_indices = @transform_0, window_bounds = array<i64: 8, 64>}, {transform_indices = @transform_1, window_bounds = array<i64: 8, 64>}, {transform_indices = @transform_2, window_bounds = array<i64: 8, 64>}]} {
    %c0 = arith.constant 0 : index
    %c0_0 = arith.constant 0 : index
    %0 = vector.load %arg2[%c0, %c0_0] : memref<8x64xf32, #tpu.memory_space<vmem>>, vector<8x64xf32>
    %c0_1 = arith.constant 0 : index
    %c0_2 = arith.constant 0 : index
    %1 = vector.load %arg3[%c0_1, %c0_2] : memref<8x64xf32, #tpu.memory_space<vmem>>, vector<8x64xf32>
    %2 = arith.addf %0, %1 : vector<8x64xf32>
    %c0_3 = arith.constant 0 : index
    %c0_4 = arith.constant 0 : index
    %3 = vector.load %arg4[%c0_3, %c0_4] : memref<8x64xf32, #tpu.memory_space<vmem>>, vector<8x64xf32>
    tpu.vector_store %arg4[%c0_3, %c0_4], %2 {strides = array<i32>} : memref<8x64xf32, #tpu.memory_space<vmem>>, vector<8x64xf32>,
    return
  }
  func.func @transform_0(%arg0: i32, %arg1: memref<1xi32, #tpu.memory_space<smem>>) -> (i32, i32) {
    %c0_i32 = arith.constant 0 : i32
    %c0_i32_0 = arith.constant 0 : i32
    return %arg0, %c0_i32 : i32, i32
  }
  func.func @transform_1(%arg0: i32, %arg1: memref<1xi32, #tpu.memory_space<smem>>) -> (i32, i32) {
    %c0_i32 = arith.constant 0 : i32
    %c0_i32_0 = arith.constant 0 : i32
    return %arg0, %c0_i32 : i32, i32
  }
  func.func @transform_2(%arg0: i32, %arg1: memref<1xi32, #tpu.memory_space<smem>>) -> (i32, i32) {
    %c0_i32 = arith.constant 0 : i32
    %c0_i32_0 = arith.constant 0 : i32
    return %arg0, %c0_i32 : i32, i32
  }
}

</mosaic_0001>

<bundles_post_ra>
// kernel: tpu_custom_call.1
= control target key start
LH: loop header
LB: loop body
LE: loop exit
PB: predicated region body
PF: predicated region fallthrough
CT: control target
= control target key end

     0   :  { %9 = vsyncpa [#allocation5], 0  ;;  %s178_s0 = inlined_call_operand.<no memory space> [shape: s32[1], index: 0, kind: input, shape index: {}]   ;;  %s179_s1 = inlined_call_operand.hbm [shape: f32[8,64], index: 1, kind: input, shape index: {}]   ;;  %s180_s2 = inlined_call_operand.hbm [shape: f32[8,64], index: 2, kind: input, shape index: {}]   ;;  %s181_s3 = inlined_call_operand.hbm [shape: f32[8,64], index: 3, kind: output, shape index: {}]  }
   0x1   :  { %10 = vsyncpa [#allocation8], 0 }
   0x2   :  { %11 = vsyncpa [#allocation6], 0  ;;  %s17_s14 = sshll.u32 %s179_s1, 4  ;;  %s146_s15 = smov [#allocation4]   ;;  %s18_s14 = int_to_ptr.hbm [resolvable:$true] %s17_s14 }
   0x3   :  { %s19_s16 = sshll.u32 %s146_s15, 4  ;;  %s28_s18 = sshll.u32 %s180_s2, 4  ;;  %s20_s16 = int_to_ptr.vmem [resolvable:$true] %s19_s16  ;;  %s29_s18 = int_to_ptr.hbm [resolvable:$true] %s28_s18 }
   0x4   :  { %22 = dma.hbm_to_vmem [thread:$0]  %s18_s14, 128, %s20_s16, [#allocation5]  }
   0x5   :  { %s147_s19 = smov [#allocation7]  }
   0x6   :  { %s30_s20 = sshll.u32 %s147_s19, 4  ;;  %s31_s20 = int_to_ptr.vmem [resolvable:$true] %s30_s20 }
   0x7   :  { %33 = dma.hbm_to_vmem [thread:$0]  %s29_s18, 128, %s31_s20, [#allocation8]  }
   0x8   :  { %140 = dma.done.wait [#allocation5], 128  }
   0x9   :  { %141 = vsyncadd [#allocation5], 4294967168 }
   0xa   :  { %142 = dma.done.wait [#allocation8], 128  }
   0xb   :  { %143 = vsyncadd [#allocation8], 4294967168  ;;  %s148_s21 = smov [#allocation9]   ;;  %s54_s24 = sshll.u32 %s181_s3, 4  ;;  %v42_v0 = vld [vmem:[#allocation4] sm:$0xff]  ;;  %v43_v1 = vld [vmem:[#allocation7] sm:$0xff]  ;;  %s55_s24 = int_to_ptr.hbm [resolvable:$true] %s54_s24 }
   0xc   :  { %s52_s1 = sshll.u32 %s148_s21, 4  ;;  %vm45_vm0 = vcmask 523264   ;;  %v44_v2 = vadd.f32 %v43_v1, %v42_v0  ;;  %s53_s1 = int_to_ptr.vmem [resolvable:$true] %s52_s1 }
   0xe   :  { %46 = vst.msk [vmem:[#allocation9] sm:$0xff] %vm45_vm0, %v44_v2 }
   0xf   :  { %57 = dma.vmem_to_hbm [thread:$0]  %s53_s1, 128, %s55_s24, [#allocation6]  }
  0x10   :  { %144 = dma.done.wait [#allocation6], 128  }
  0x11   :  { %145 = vsyncadd [#allocation6], 4294967168 }
  0x12   :  { %62 = vsyncpa [#allocation5], 1 }
  0x13   :  { %63 = vsyncpa [#allocation8], 1 }
  0x14   :  { %64 = vsyncpa [#allocation6], 1 }

</bundles_post_ra>
